<compile_context>
chip_gen: v5e
topology: v5e:2x2
jax: 0.10.0
libtpu: 0.0.40
codegen_flags: <defaults>
</compile_context>

<pallas_src>
import functools

import jax
import jax.numpy as jnp
from jax.experimental import pallas as pl
from jax.experimental.pallas import tpu as pltpu


_COEF_LANES = 128  # lane-dense width of the coefficient / moment matrices


def _cpt_loss_kernel(a_ref, coef_ref, o_ref, *, H):
    """One grid step: B flattened maps (B, W*H) -> one partial-sum scalar."""
    a = a_ref[...]                                  # (B, WH), native dtype
    WH = a.shape[-1]

    h_f = jnp.float32(H)
    inv_h = jnp.float32(1.0 / H)

    # ---- per-row argmax (first occurrence, matches torch.max indices) ----
    m = jnp.max(a, axis=-1, keepdims=True)                          # (B, 1)
    flat = jax.lax.broadcasted_iota(jnp.int32, (1, WH), 1).astype(jnp.float32)
    sel = jnp.where(a == m, flat, jnp.float32(WH))                  # (B, WH)
    idx = jnp.min(sel, axis=-1, keepdims=True)                      # (B, 1) f32
    tx = jnp.floor((idx + 0.5) * inv_h)                             # idx // H
    ty = idx - tx * h_f                                             # idx %  H

    # ---- fused moments via one MXU matmul: a @ [1 | x | y | x^2+y^2 | 0] --
    a_mm = a if a.dtype == jnp.float32 else a.astype(jnp.float32)
    moments = jnp.dot(a_mm, coef_ref[...],
                      preferred_element_type=jnp.float32)           # (B, 128)
    s0 = moments[:, 0:1]
    sx = moments[:, 1:2]
    sy = moments[:, 2:3]
    sr2 = moments[:, 3:4]

    # sum(a * ((x - tx)^2 + (y - ty)^2)) per row
    row = sr2 - 2.0 * (tx * sx + ty * sy) + (tx * tx + ty * ty) * s0  # (B, 1)

    # One scalar per grid step, emitted lane-dense (partial sum in lane 0).
    block_sum = jnp.sum(row)
    lane = jax.lax.broadcasted_iota(jnp.int32, (1, _COEF_LANES), 1)
    o_ref[...] = jnp.where(lane == 0, block_sum, 0.0)


def _round_up(x, m):
    return ((x + m - 1) // m) * m


def _sublane_multiple(dtype):
    # dtype-native packing multiple: 8 for 4-byte, 16 for 2-byte, 32 for 1-byte
    return {4: 8, 2: 16, 1: 32}.get(jnp.dtype(dtype).itemsize, 8)


def cpt_loss(atten_map, *, block_rows=None):
    """Pallas implementation of cpt_loss.forward. Returns a scalar float32."""
    N, L, W, H = atten_map.shape
    WH = W * H
    rows = N * L
    # f32 index/coordinate math in the kernel is exact only for small maps.
    assert WH < (1 << 21), "attention map too large for f32 index math"

    x = atten_map.reshape(rows, WH)        # stream native dtype (no f32 copy)
    sub = _sublane_multiple(x.dtype)

    # Grid-invariant coefficient matrix (f32 so x^2+y^2 stays exact).
    flat_i = jnp.arange(WH, dtype=jnp.int32)
    xf = (flat_i // H).astype(jnp.float32)
    yf = (flat_i % H).astype(jnp.float32)
    coef = jnp.zeros((WH, _COEF_LANES), jnp.float32)
    coef = coef.at[:, 0].set(1.0)
    coef = coef.at[:, 1].set(xf)
    coef = coef.at[:, 2].set(yf)
    coef = coef.at[:, 3].set(xf * xf + yf * yf)

    # Row-block selection: ~4 MiB input tile (8 MiB double-buffered), rounded
    # to the dtype sublane multiple; keep >= 2 grid steps when rows allow so
    # the parallel axis can shard across both v7x TensorCores.
    if block_rows is None:
        target_tile_bytes = 4 * 1024 * 1024
        block_rows = max(sub, target_tile_bytes // (WH * x.dtype.itemsize))
    B = max(sub, (int(block_rows) // sub) * sub)
    rows_rounded = _round_up(rows, sub)
    if rows > 2 * sub:
        B = min(B, _round_up((rows + 1) // 2, sub))
    else:
        B = min(B, rows_rounded)
    padded = _round_up(rows, B)
    if padded != rows:
        # Zero rows contribute exactly 0 (argmax -> (0,0), all moments 0).
        x = jnp.pad(x, ((0, padded - rows), (0, 0)))
    G = padded // B

    partials = pl.pallas_call(
        functools.partial(_cpt_loss_kernel, H=H),
        out_shape=jax.ShapeDtypeStruct((G, _COEF_LANES), jnp.float32),
        grid=(G,),
        in_specs=[
            pl.BlockSpec((B, WH), lambda i: (i, 0)),
            pl.BlockSpec((WH, _COEF_LANES), lambda i: (0, 0)),  # grid-invariant
        ],
        out_specs=pl.BlockSpec((1, _COEF_LANES), lambda i: (i, 0)),
        compiler_params=pltpu.CompilerParams(
            dimension_semantics=("parallel",),
            vmem_limit_bytes=32 * 1024 * 1024,
        ),
    )(x, coef)

    inv_denom = 1.0 / float(N * L * W * H)
    return jnp.sum(partials) * jnp.float32(inv_denom)


def _cpt_loss_ref(atten_map):
    """Pure-JAX reference mirroring the PyTorch code, for verification."""
    N, L, W, H = atten_map.shape
    xp = jnp.arange(W, dtype=jnp.int32)[:, None]
    yp = jnp.arange(H, dtype=jnp.int32)[None, :]
    flat = atten_map.reshape(N, L, -1)
    idx = jnp.argmax(flat, axis=-1).astype(jnp.int32)
    tx = idx // H
    ty = idx - H * tx
    pos = ((xp[None, None] - tx[:, :, None, None]) ** 2
           + (yp[None, None] - ty[:, :, None, None]) ** 2)
    loss = atten_map * pos.astype(atten_map.dtype)
    return loss.reshape(N, -1).mean(-1).mean()


if __name__ == "__main__":
    key = jax.random.PRNGKey(0)

    # Main check: small shape matching the module's expected input layout.
    N, L, W, H = 2, 4, 16, 16
    atten_map = jax.random.uniform(key, (N, L, W, H), dtype=jnp.float32)
    loss = cpt_loss(atten_map)
    jax.block_until_ready(loss)
    ref = _cpt_loss_ref(atten_map)
    assert jnp.allclose(loss, ref, rtol=1e-4, atol=1e-4), (loss, ref)

    # Second check: force a multi-block grid with zero-row padding.
    atten_map2 = jax.random.uniform(jax.random.PRNGKey(1), (2, 5, 16, 16),
                                    dtype=jnp.float32)
    loss2 = cpt_loss(atten_map2, block_rows=8)
    jax.block_until_ready(loss2)
    ref2 = _cpt_loss_ref(atten_map2)
    assert jnp.allclose(loss2, ref2, rtol=1e-4, atol=1e-4), (loss2, ref2)

    # Third check: enough rows that the default path uses >= 2 grid steps.
    atten_map3 = jax.random.uniform(jax.random.PRNGKey(2), (4, 64, 16, 16),
                                    dtype=jnp.float32)
    loss3 = cpt_loss(atten_map3)
    jax.block_until_ready(loss3)
    ref3 = _cpt_loss_ref(atten_map3)
    assert jnp.allclose(loss3, ref3, rtol=1e-4, atol=1e-4), (loss3, ref3)

    print("KERNEL_OK")
</pallas_src>

<mosaic_0001>
module attributes {stable_mosaic.version = 11 : i64} {
  func.func @_cpt_loss_kernel(%arg0: i32, %arg1: memref<8x256xf32, #tpu.memory_space<vmem>>, %arg2: memref<256x128xf32, #tpu.memory_space<vmem>>, %arg3: memref<1x128xf32, #tpu.memory_space<vmem>>) attributes {dimension_semantics = [#tpu.dimension_semantics<parallel>], iteration_bounds = array<i64: 1>, scalar_prefetch = 0 : i64, scratch_operands = 0 : i64, tpu.core_type = #tpu.core_type<tc>, window_params = [{transform_indices = @transform_0, window_bounds = array<i64: 8, 256>}, {pipeline_mode = #tpu.pipeline_mode<synchronous>, transform_indices = @transform_1, window_bounds = array<i64: 256, 128>}, {transform_indices = @transform_2, window_bounds = array<i64: 1, 128>}]} {
    %c0 = arith.constant 0 : index
    %c0_0 = arith.constant 0 : index
    %0 = vector.load %arg1[%c0, %c0_0] : memref<8x256xf32, #tpu.memory_space<vmem>>, vector<8x256xf32>
    %cst = arith.constant dense<0xFF800000> : vector<8xf32>
    %1 = vector.multi_reduction <maximumf>, %0, %cst [1] : vector<8x256xf32> to vector<8xf32>
    %2 = vector.shape_cast %1 : vector<8xf32> to vector<8x1xf32>
    %3 = tpu.iota {dimensions = array<i32: 1>} : vector<1x256xi32>
    %4 = arith.sitofp %3 : vector<1x256xi32> to vector<1x256xf32>
    %5 = vector.broadcast %2 : vector<8x1xf32> to vector<8x256xf32>
    %6 = arith.cmpf oeq, %0, %5 : vector<8x256xf32>
    %cst_1 = arith.constant 2.560000e+02 : f32
    %7 = vector.shape_cast %4 : vector<1x256xf32> to vector<1x256xf32>
    %8 = vector.broadcast %7 : vector<1x256xf32> to vector<8x256xf32>
    %9 = vector.broadcast %cst_1 : f32 to vector<8x256xf32>
    %10 = arith.select %6, %8, %9 : vector<8x256xi1>, vector<8x256xf32>
    %cst_2 = arith.constant dense<0x7F800000> : vector<8xf32>
    %11 = vector.multi_reduction <minimumf>, %10, %cst_2 [1] : vector<8x256xf32> to vector<8xf32>
    %12 = vector.shape_cast %11 : vector<8xf32> to vector<8x1xf32>
    %cst_3 = arith.constant 5.000000e-01 : f32
    %13 = vector.broadcast %cst_3 : f32 to vector<8x1xf32>
    %14 = arith.addf %12, %13 : vector<8x1xf32>
    %cst_4 = arith.constant 6.250000e-02 : f32
    %15 = vector.broadcast %cst_4 : f32 to vector<8x1xf32>
    %16 = arith.mulf %14, %15 : vector<8x1xf32>
    %17 = math.floor %16 : vector<8x1xf32>
    %cst_5 = arith.constant 1.600000e+01 : f32
    %18 = vector.broadcast %cst_5 : f32 to vector<8x1xf32>
    %19 = arith.mulf %17, %18 : vector<8x1xf32>
    %20 = arith.subf %12, %19 : vector<8x1xf32>
    %c0_6 = arith.constant 0 : index
    %c0_7 = arith.constant 0 : index
    %21 = vector.load %arg2[%c0_6, %c0_7] : memref<256x128xf32, #tpu.memory_space<vmem>>, vector<256x128xf32>
    %cst_8 = arith.constant dense<0.000000e+00> : vector<8x128xf32>
    %22 = tpu.matmul %0, %21, %cst_8 {dimension_numbers = #tpu.dot_dimension_numbers<[1], [0], [0], [1], [0, 0, 1, 1], [], []>} : vector<8x256xf32>, vector<256x128xf32>, vector<8x128xf32> -> vector<8x128xf32>
    %23 = vector.extract_strided_slice %22 {offsets = [0, 0], sizes = [8, 1], strides = [1, 1]} : vector<8x128xf32> to vector<8x1xf32>
    %24 = vector.extract_strided_slice %22 {offsets = [0, 1], sizes = [8, 1], strides = [1, 1]} : vector<8x128xf32> to vector<8x1xf32>
    %25 = vector.extract_strided_slice %22 {offsets = [0, 2], sizes = [8, 1], strides = [1, 1]} : vector<8x128xf32> to vector<8x1xf32>
    %26 = vector.extract_strided_slice %22 {offsets = [0, 3], sizes = [8, 1], strides = [1, 1]} : vector<8x128xf32> to vector<8x1xf32>
    %27 = arith.mulf %17, %24 : vector<8x1xf32>
    %28 = arith.mulf %20, %25 : vector<8x1xf32>
    %29 = arith.addf %27, %28 : vector<8x1xf32>
    %cst_9 = arith.constant 2.000000e+00 : f32
    %30 = vector.broadcast %cst_9 : f32 to vector<8x1xf32>
    %31 = arith.mulf %30, %29 : vector<8x1xf32>
    %32 = arith.subf %26, %31 : vector<8x1xf32>
    %33 = arith.mulf %17, %17 : vector<8x1xf32>
    %34 = arith.mulf %20, %20 : vector<8x1xf32>
    %35 = arith.addf %33, %34 : vector<8x1xf32>
    %36 = arith.mulf %35, %23 : vector<8x1xf32>
    %37 = arith.addf %32, %36 : vector<8x1xf32>
    %38 = vector.shape_cast %37 : vector<8x1xf32> to vector<1x8x1xf32>
    %cst_10 = arith.constant dense<0.000000e+00> : vector<1xf32>
    %39 = vector.multi_reduction <add>, %38, %cst_10 [1, 2] : vector<1x8x1xf32> to vector<1xf32>
    %40 = vector.shape_cast %39 : vector<1xf32> to vector<1x1x1xf32>
    %41 = vector.extract %40[0, 0, 0] : f32 from vector<1x1x1xf32>
    %42 = tpu.iota {dimensions = array<i32: 1>} : vector<1x128xi32>
    %c0_i32 = arith.constant 0 : i32
    %43 = vector.broadcast %c0_i32 : i32 to vector<1x128xi32>
    %44 = arith.cmpi eq, %42, %43 : vector<1x128xi32>
    %cst_11 = arith.constant 0.000000e+00 : f32
    %45 = vector.broadcast %41 : f32 to vector<1x128xf32>
    %46 = vector.broadcast %cst_11 : f32 to vector<1x128xf32>
    %47 = arith.select %44, %45, %46 : vector<1x128xi1>, vector<1x128xf32>
    %c0_12 = arith.constant 0 : index
    %c0_13 = arith.constant 0 : index
    %48 = vector.load %arg3[%c0_12, %c0_13] : memref<1x128xf32, #tpu.memory_space<vmem>>, vector<1x128xf32>
    tpu.vector_store %arg3[%c0_12, %c0_13], %47 {strides = array<i32>} : memref<1x128xf32, #tpu.memory_space<vmem>>, vector<1x128xf32>,
    return
  }
  func.func @transform_0(%arg0: i32) -> (i32, i32) {
    %c0_i32 = arith.constant 0 : i32
    %c0_i32_0 = arith.constant 0 : i32
    return %arg0, %c0_i32 : i32, i32
  }
  func.func @transform_1(%arg0: i32) -> (i32, i32) {
    %c0_i32 = arith.constant 0 : i32
    %c0_i32_0 = arith.constant 0 : i32
    %c0_i32_1 = arith.constant 0 : i32
    return %c0_i32, %c0_i32_0 : i32, i32
  }
  func.func @transform_2(%arg0: i32) -> (i32, i32) {
    %c0_i32 = arith.constant 0 : i32
    %c0_i32_0 = arith.constant 0 : i32
    return %arg0, %c0_i32 : i32, i32
  }
}

</mosaic_0001>

<bundles_post_ra>
// kernel: tpu_custom_call.1
= control target key start
LH: loop header
LB: loop body
LE: loop exit
PB: predicated region body
PF: predicated region fallthrough
CT: control target
= control target key end

     0   :  { %7 = vsyncpa [#allocation3], 0  ;;  %s327_s0 = inlined_call_operand.hbm [shape: f32[8,256], index: 0, kind: input, shape index: {}]   ;;  %s328_s1 = inlined_call_operand.hbm [shape: f32[256,128], index: 1, kind: input, shape index: {}]   ;;  %s329_s2 = inlined_call_operand.hbm [shape: f32[1,128], index: 2, kind: output, shape index: {}]  }
   0x1   :  { %8 = vsyncpa [#allocation6], 0 }
   0x2   :  { %9 = vsyncpa [#allocation4], 0  ;;  %s15_s11 = sshll.u32 %s327_s0, 4  ;;  %s284_s12 = smov [#allocation2]   ;;  %s16_s11 = int_to_ptr.hbm [resolvable:$true] %s15_s11 }
   0x3   :  { %s17_s13 = sshll.u32 %s284_s12, 4  ;;  %s25_s16 = sshll.u32 %s328_s1, 4  ;;  %s18_s13 = int_to_ptr.vmem [resolvable:$true] %s17_s13  ;;  %s26_s16 = int_to_ptr.hbm [resolvable:$true] %s25_s16 }
   0x4   :  { %20 = dma.hbm_to_vmem [thread:$0]  %s16_s11, 256, %s18_s13, [#allocation3]  }
   0x5   :  { %s285_s17 = smov [#allocation5]   ;;  %s286_s19 = smov 128  }
   0x6   :  { %s27_s18 = sshll.u32 %s285_s17, 4  ;;  %s287_s20 = smov 8   ;;  %s28_s18 = int_to_ptr.vmem [resolvable:$true] %s27_s18 }
   0x7   :  { %33 = dma.hbm_to_vmem [thread:$0]  %s26_s16, 4096, %s28_s18, [#allocation6], %s286_s19, %s286_s19, %s287_s20  }
   0x8   :  { %278 = dma.done.wait [#allocation3], 256  }
   0x9   :  { %279 = vsyncadd [#allocation3], 4294967040 }
   0xa   :  { %280 = dma.done.wait [#allocation6], 4096  }
   0xb   :  { %281 = vsyncadd [#allocation6], 4294963200  ;;  %v314_v0 = vld [vmem:[#allocation2] sm:$0xff]  ;;  %v316_v1 = vld [vmem:[#allocation2 + $0x8] sm:$0xff]  ;;  %v47_v35 = vlaneseq  ;;  %s288_s0 = smov 127   ;;  %s289_s1 = smov 3  }
   0xc   :  { %v79_v2 = vld [vmem:[#allocation5 + $0x78] sm:$0xff]  ;;  %v44_v3 = vmax.f32 %v314_v0, %v316_v1  ;;  %v78_v5 = vld [vmem:[#allocation5 + $0x70] sm:$0xff]  ;;  %v77_v7 = vld [vmem:[#allocation5 + $0x68] sm:$0xff]  ;;  %s290_s21 = smov 2   ;;  %s291_s22 = smov 125   ;;  %vm162_vm2 = vcmask 7168  }
   0xd   :  { %96 = vmatpush.msra.mxu0 %v79_v2  ;;  %v95_v4 = vld [vmem:[#allocation5 + $0xf8] sm:$0xff]  ;;  %v94_v6 = vld [vmem:[#allocation5 + $0xf0] sm:$0xff]  ;;  %v93_v8 = vld [vmem:[#allocation5 + $0xe8] sm:$0xff]  ;;  %v48_v36 = vand.u32 127, %v47_v35  ;;  %s292_s23 = smov [#allocation7]   ;;  %s184_s27 = sshll.u32 %s329_s2, 4  ;;  %s185_s27 = int_to_ptr.hbm [resolvable:$true] %s184_s27 }
   0xe   :  { %116 = vmatpush.msra.mxu1 %v95_v4  ;;  %45 = vmax.xlane.f32.xlu0 %v44_v3  ;;  %v76_v9 = vld [vmem:[#allocation5 + $0x60] sm:$0xff]  ;;  %v75_v11 = vld [vmem:[#allocation5 + $0x58] sm:$0xff]  ;;  %v74_v13 = vld [vmem:[#allocation5 + $0x50] sm:$0xff]  ;;  %s182_s24 = sshll.u32 %s292_s23, 4  ;;  %s183_s24 = int_to_ptr.vmem [resolvable:$true] %s182_s24 }
   0xf   :  { %97 = vmatpush.msra.mxu0 %v78_v5  ;;  %v92_v10 = vld [vmem:[#allocation5 + $0xe0] sm:$0xff]  ;;  %v91_v12 = vld [vmem:[#allocation5 + $0xd8] sm:$0xff]  ;;  %v90_v14 = vld [vmem:[#allocation5 + $0xd0] sm:$0xff]  ;;  %v49_v37 = vadd.s32 128, %v48_v36  ;;  %v50_v38 = vcvt.s32.f32 %v48_v36  ;;  %vm173_vm3 = vcmp.eq.s32.totalorder %v48_v36, 0 }
  0x10   :  { %117 = vmatpush.msra.mxu1 %v94_v6  ;;  %v73_v15 = vld [vmem:[#allocation5 + $0x48] sm:$0xff]  ;;  %v72_v17 = vld [vmem:[#allocation5 + $0x40] sm:$0xff]  ;;  %v71_v19 = vld [vmem:[#allocation5 + $0x38] sm:$0xff] }
  0x11   :  { %98 = vmatpush.msra.mxu0 %v77_v7  ;;  %v89_v16 = vld [vmem:[#allocation5 + $0xc8] sm:$0xff]  ;;  %v88_v18 = vld [vmem:[#allocation5 + $0xc0] sm:$0xff]  ;;  %v87_v20 = vld [vmem:[#allocation5 + $0xb8] sm:$0xff]  ;;  %v51_v39 = vcvt.s32.f32 %v49_v37 }
  0x12   :  { %118 = vmatpush.msra.mxu1 %v93_v8  ;;  %v70_v21 = vld [vmem:[#allocation5 + $0x30] sm:$0xff]  ;;  %v69_v23 = vld [vmem:[#allocation5 + $0x28] sm:$0xff]  ;;  %v68_v25 = vld [vmem:[#allocation5 + $0x20] sm:$0xff] }
  0x13   :  { %99 = vmatpush.msra.mxu0 %v76_v9  ;;  %v86_v22 = vld [vmem:[#allocation5 + $0xb0] sm:$0xff]  ;;  %v85_v24 = vld [vmem:[#allocation5 + $0xa8] sm:$0xff]  ;;  %v84_v26 = vld [vmem:[#allocation5 + $0xa0] sm:$0xff] }
  0x14   :  { %119 = vmatpush.msra.mxu1 %v92_v10  ;;  %v67_v27 = vld [vmem:[#allocation5 + $0x18] sm:$0xff]  ;;  %v66_v29 = vld [vmem:[#allocation5 + $0x10] sm:$0xff]  ;;  %v65_v31 = vld [vmem:[#allocation5 + $0x8] sm:$0xff] }
  0x15   :  { %100 = vmatpush.msra.mxu0 %v75_v11  ;;  %v83_v28 = vld [vmem:[#allocation5 + $0x98] sm:$0xff]  ;;  %v82_v30 = vld [vmem:[#allocation5 + $0x90] sm:$0xff]  ;;  %v81_v32 = vld [vmem:[#allocation5 + $0x88] sm:$0xff] }
  0x16   :  { %120 = vmatpush.msra.mxu1 %v91_v12  ;;  %v64_v33 = vld [vmem:[#allocation5] sm:$0xff] }
  0x17   :  { %101 = vmatpush.msra.mxu0 %v74_v13  ;;  %v80_v34 = vld [vmem:[#allocation5 + $0x80] sm:$0xff] }
  0x18   :  { %121 = vmatpush.msra.mxu1 %v90_v14 }
  0x19   :  { %102 = vmatpush.msra.mxu0 %v73_v15 }
  0x1a   :  { %122 = vmatpush.msra.mxu1 %v89_v16 }
  0x1b   :  { %103 = vmatpush.msra.mxu0 %v72_v17 }
  0x1c   :  { %123 = vmatpush.msra.mxu1 %v88_v18 }
  0x1d   :  { %104 = vmatpush.msra.mxu0 %v71_v19 }
  0x1e   :  { %124 = vmatpush.msra.mxu1 %v87_v20 }
  0x1f   :  { %105 = vmatpush.msra.mxu0 %v70_v21 }
  0x20   :  { %125 = vmatpush.msra.mxu1 %v86_v22 }
  0x21   :  { %106 = vmatpush.msra.mxu0 %v69_v23 }
  0x22   :  { %126 = vmatpush.msra.mxu1 %v85_v24 }
  0x23   :  { %107 = vmatpush.msra.mxu0 %v68_v25 }
  0x24   :  { %127 = vmatpush.msra.mxu1 %v84_v26 }
  0x25   :  { %108 = vmatpush.msra.mxu0 %v67_v27 }
  0x26   :  { %128 = vmatpush.msra.mxu1 %v83_v28 }
  0x27   :  { %109 = vmatpush.msra.mxu0 %v66_v29 }
  0x28   :  { %129 = vmatpush.msra.mxu1 %v82_v30 }
  0x29   :  { %110 = vmatpush.msra.mxu0 %v65_v31 }
  0x2a   :  { %130 = vmatpush.msra.mxu1 %v81_v32 }
  0x2b   :  { %111 = vmatpush.msra.mxu0 %v64_v33 }
  0x2c   :  { %131 = vmatpush.msra.mxu1 %v80_v34  ;;  %112 = vmatmul.f32.vlgmr.msra.gmra.mxu0 %v314_v0 }
  0x2d   :  { %132 = vmatmul.f32.vlgmr.msra.gmra.mxu1 %v316_v1 }
  0x81   :  { %v46_v40 = vpop.xlane.xlu0 %45 }
  0x82   :  { %vm52_vm0 = vcmp.eq.f32.partialorder %v314_v0, %v46_v40  ;;  %vm53_vm1 = vcmp.eq.f32.partialorder %v316_v1, %v46_v40 }
  0x83   :  { %v54_v41 = vsel %vm52_vm0, %v50_v38, 256.0  ;;  %v55_v42 = vsel %vm53_vm1, %v51_v39, 256.0 }
  0x84   :  { %v56_v43 = vmin.f32 %v54_v41, %v55_v42 }
  0x86   :  { %57 = vmin.xlane.f32.xlu0 %v56_v43 }
  0xa9   :  { %v113_v48 = vpop.f32.mrf.mxu0 }
  0xaa   :  { %v133_v49 = vpop.f32.mrf.mxu1 }
  0xab   :  { %v134_v52 = vadd.f32 %v133_v49, %v113_v48 }
  0xf9   :  { %v58_v44 = vpop.xlane.xlu0 %57 }
  0xfa   :  { %v59_v45 = vadd.f32 0.5, %v58_v44 }
  0xfc   :  { %v60_v46 = vmul.f32 0.0625, %v59_v45 }
  0xfe   :  { %v61_v47 = vfloor.f32 %v60_v46 }
 0x100   :  { %v62_v50 = vmul.f32 16.0, %v61_v47  ;;  %v149_v55 = vmul.f32 %v61_v47, %v61_v47  ;;  %v136_v58 = vmul.f32 %v134_v52, %v61_v47 }
 0x102   :  { %v63_v51 = vsub.f32 %v58_v44, %v62_v50 }
 0x104   :  { %v150_v53 = vmul.f32 %v63_v51, %v63_v51  ;;  %v137_v54 = vmul.f32 %v134_v52, %v63_v51 }
 0x106   :  { %139 = vrot.lane.b32.xlu1 %v137_v54, %s288_s0  ;;  %v151_v56 = vadd.f32 %v150_v53, %v149_v55 }
 0x108   :  { %v152_v57 = vmul.f32 %v151_v56, %v134_v52 }
 0x10a   :  { %154 = vrot.lane.b32.xlu2 %v152_v57, %s289_s1 }
 0x164   :  { %v155_v0 = vpop.permute.xlu2 %154 }
 0x178   :  { %v140_v59 = vpop.permute.xlu1 %139 }
 0x179   :  { %v142_v60 = vadd.f32 %v140_v59, %v136_v58 }
 0x17b   :  { %v143_v61 = vmul.f32 2.0, %v142_v60 }
 0x17d   :  { %145 = vrot.lane.b32.xlu1 %v143_v61, %s290_s21 }
 0x1ef   :  { %v146_v62 = vpop.permute.xlu1 %145 }
 0x1f0   :  { %v148_v63 = vsub.f32 %v134_v52, %v146_v62 }
 0x1f2   :  { %v157_v1 = vadd.f32 %v155_v0, %v148_v63 }
 0x1f4   :  { %159 = vrot.lane.b32.xlu2 %v157_v1, %s291_s22 }
 0x24e   :  { %v160_v2 = vpop.permute.xlu2 %159 }
 0x24f   :  { %v163_v3 = vsel %vm162_vm2, %v160_v2, 0.0 }
 0x250   :  { %164 = vadd.xlane.f32.xlu0 %v163_v3 }
 0x2c3   :  { %v165_v4 = vpop.xlane.xlu0 %164 }
 0x2c4   :  { %v166_v5 = vrot.slane %v165_v4, 4 }
 0x2c6   :  { %v167_v6 = vadd.f32 %v166_v5, %v165_v4 }
 0x2c8   :  { %v168_v7 = vrot.slane %v167_v6, 2 }
 0x2ca   :  { %v169_v8 = vadd.f32 %v168_v7, %v167_v6 }
 0x2cc   :  { %v170_v9 = vrot.slane %v169_v8, 1 }
 0x2ce   :  { %v171_v10 = vadd.f32 %v170_v9, %v169_v8 }
 0x2d0   :  { %195 = vpush %v171_v10 }
 0x301   :  { %s196_s28 = spop %195 }
 0x302   :  { %v174_v11 = vstv %s196_s28 }
 0x303   :  { %v175_v12 = vsel %vm173_vm3, %v174_v11, 0.0 }
 0x304   :  { %176 = vst [vmem:[#allocation7] sm:$0x1] %v175_v12 }
 0x305   :  { %187 = dma.vmem_to_hbm [thread:$0]  %s183_s24, 16, %s185_s27, [#allocation4]  }
 0x306   :  { %282 = dma.done.wait [#allocation4], 16  }
 0x307   :  { %283 = vsyncadd [#allocation4], 4294967280 }
 0x308   :  { %192 = vsyncpa [#allocation3], 1 }
 0x309   :  { %193 = vsyncpa [#allocation6], 1 }
 0x30a   :  { %194 = vsyncpa [#allocation4], 1 }

</bundles_post_ra>
